<compile_context>
chip_gen: v7x
topology: tpu7x:2x2x1
jax: 0.10.0
libtpu: 0.0.40
codegen_flags: <defaults>
</compile_context>

<pallas_src>
import jax
import jax.numpy as jnp
from jax.experimental import pallas as pl
from jax.experimental.pallas import tpu as pltpu

D_IN = 28 * 28   # 784
LANE = 128       # lane-dense padded width for hidden layers and logits


def _round_up(n, m):
    return ((n + m - 1) // m) * m


def _pad_to(a, shape):
    return jnp.pad(a, [(0, t - s) for s, t in zip(a.shape, shape)])


def mlp_kernel(x_ref, w1_ref, b1_ref, w2_ref, b2_ref, w3_ref, b3_ref, o_ref):
    # Cast the f32 input tile to bf16 in-register (VPU cycles hidden under the x DMA).
    x = x_ref[...].astype(jnp.bfloat16)
    # Layer 1: Linear(784 -> 64, padded to 128) + ReLU. bf16 x bf16, f32 accumulation.
    h1 = jnp.dot(x, w1_ref[...], preferred_element_type=jnp.float32)
    h1 = jnp.maximum(h1 + b1_ref[...], 0.0)
    # Layer 2: Linear(64 -> 32, padded to 128) + ReLU. Zero-padded cols stay zero.
    h2 = jnp.dot(h1.astype(jnp.bfloat16), w2_ref[...],
                 preferred_element_type=jnp.float32)
    h2 = jnp.maximum(h2 + b2_ref[...], 0.0)
    # Layer 3: Linear(32 -> 10, padded to 128), no activation. Lane-dense bf16 store.
    h3 = jnp.dot(h2.astype(jnp.bfloat16), w3_ref[...],
                 preferred_element_type=jnp.float32)
    o_ref[...] = (h3 + b3_ref[...]).astype(o_ref.dtype)


def prepare_params(params):
    """Pad/cast weights once (hoisted out of the per-call path).

    Weights -> bf16, zero-padded to 128 lanes; biases stay f32 (added to f32 accum).
    """
    w1, b1, w2, b2, w3, b3 = params
    w1p = _pad_to(w1.astype(jnp.bfloat16), (D_IN, LANE))
    b1p = _pad_to(b1.reshape(1, -1).astype(jnp.float32), (1, LANE))
    w2p = _pad_to(w2.astype(jnp.bfloat16), (LANE, LANE))
    b2p = _pad_to(b2.reshape(1, -1).astype(jnp.float32), (1, LANE))
    w3p = _pad_to(w3.astype(jnp.bfloat16), (LANE, LANE))
    b3p = _pad_to(b3.reshape(1, -1).astype(jnp.float32), (1, LANE))
    return (w1p, b1p, w2p, b2p, w3p, b3p)


def simple_nn_forward(x_nchw, prepared_params, *, tb=2048):
    """x_nchw: (B, 1, 28, 28) float32 -> logits (B, 10) float32.

    prepared_params: output of prepare_params().
    tb: batch tile (rows per grid step). 2048 f32 rows = 6.3 MiB per x buffer
    (12.5 MiB double-buffered) + ~1.5 MiB output/weight buffers — well inside the
    48 MiB scoped-VMEM cap on v5e/v6e/v7x.
    """
    w1p, b1p, w2p, b2p, w3p, b3p = prepared_params
    B = x_nchw.shape[0]

    # Same flatten as torch's x.view(B, -1); kept f32 — bf16 cast happens in-kernel.
    x = x_nchw.reshape(B, D_IN)

    # Batch tiling: tile is a sublane multiple; pad B so the grid divides evenly
    # (padded rows are computed on zeros and sliced off — never exposed).
    b8 = _round_up(B, 8)
    tb_eff = min(tb, b8)
    # Guarantee >=2 grid steps when the batch allows it, so the "parallel" batch
    # axis puts one step on each v7x TensorCore (no-op on single-TC v5e/v6e).
    if b8 >= 16 and tb_eff >= b8:
        tb_eff = _round_up((b8 + 1) // 2, 8)
    b_pad = _round_up(B, tb_eff)
    if b_pad != B:
        x = jnp.pad(x, ((0, b_pad - B), (0, 0)))
    grid = (b_pad // tb_eff,)

    const2d = lambda i: (0, 0)
    row_map = lambda i: (i, 0)

    cost = pl.CostEstimate(
        flops=2 * b_pad * (D_IN * LANE + LANE * LANE + LANE * LANE),
        bytes_accessed=(
            b_pad * D_IN * 4                      # f32 x read
            + b_pad * LANE * 2                    # bf16 padded logits write
            + D_IN * LANE * 2 + LANE * 4          # w1 (bf16) + b1 (f32)
            + 2 * (LANE * LANE * 2 + LANE * 4)    # w2/b2, w3/b3
        ),
        transcendentals=0,
    )

    out = pl.pallas_call(
        mlp_kernel,
        out_shape=jax.ShapeDtypeStruct((b_pad, LANE), jnp.bfloat16),
        grid=grid,
        in_specs=[
            pl.BlockSpec((tb_eff, D_IN), row_map),   # x tile: streamed & double-buffered
            pl.BlockSpec((D_IN, LANE), const2d),     # w1: resident across grid steps
            pl.BlockSpec((1, LANE), const2d),        # b1
            pl.BlockSpec((LANE, LANE), const2d),     # w2
            pl.BlockSpec((1, LANE), const2d),        # b2
            pl.BlockSpec((LANE, LANE), const2d),     # w3
            pl.BlockSpec((1, LANE), const2d),        # b3
        ],
        out_specs=pl.BlockSpec((tb_eff, LANE), row_map),
        compiler_params=pltpu.CompilerParams(
            dimension_semantics=("parallel",),       # shards batch steps across v7x's 2 TCs
            vmem_limit_bytes=48 * 1024 * 1024,       # <= ~48 MiB: safe on v7x's 64 MiB VMEM
        ),
        cost_estimate=cost,
    )(x, w1p, b1p, w2p, b2p, w3p, b3p)

    return out[:B, :10].astype(jnp.float32)


def init_params(key):
    """Deterministic init mimicking PyTorch default uniform(-1/sqrt(fan_in), +)."""
    def linear(k, fan_in, fan_out):
        kw, kb = jax.random.split(k)
        bound = 1.0 / jnp.sqrt(fan_in)
        w = jax.random.uniform(kw, (fan_in, fan_out), jnp.float32, -bound, bound)
        b = jax.random.uniform(kb, (1, fan_out), jnp.float32, -bound, bound)
        return w, b

    k1, k2, k3 = jax.random.split(key, 3)
    w1, b1 = linear(k1, D_IN, 64)
    w2, b2 = linear(k2, 64, 32)
    w3, b3 = linear(k3, 32, 10)
    return (w1, b1, w2, b2, w3, b3)


if __name__ == "__main__":
    key = jax.random.PRNGKey(0)
    k_params, k_x = jax.random.split(key)

    params = init_params(k_params)
    prepared = jax.tree_util.tree_map(jax.block_until_ready, prepare_params(params))

    # Small deterministic input batch in NCHW, like MNIST digits.
    x = jax.random.normal(k_x, (2, 1, 28, 28), dtype=jnp.float32)

    logits = jax.jit(simple_nn_forward)(x, prepared)
    jax.block_until_ready(logits)

    # Correctness check vs plain-JAX reference mirroring the kernel's bf16 quantization
    # (x/w1 and h1/w2, h2/w3 in bf16, f32 accumulation, bf16 output store).
    w1, b1, w2, b2, w3, b3 = params
    hp = lambda a, b: jnp.dot(a, b, precision=jax.lax.Precision.HIGHEST,
                              preferred_element_type=jnp.float32)
    q = lambda a: a.astype(jnp.bfloat16).astype(jnp.float32)
    xf = x.reshape(x.shape[0], -1)
    ref = jnp.maximum(hp(q(xf), q(w1)) + b1, 0.0)
    ref = jnp.maximum(hp(q(ref), q(w2)) + b2, 0.0)
    ref = hp(q(ref), q(w3)) + b3
    ref = ref.astype(jnp.bfloat16).astype(jnp.float32)

    assert logits.shape == (2, 10)
    assert jnp.allclose(logits, ref, atol=2e-2, rtol=2e-2), (
        float(jnp.max(jnp.abs(logits - ref))))

    print("KERNEL_OK")
</pallas_src>

<mosaic_0001>
module attributes {stable_mosaic.version = 11 : i64} {
  func.func @mlp_kernel(%arg0: i32, %arg1: memref<8x784xf32, #tpu.memory_space<vmem>>, %arg2: memref<784x128xbf16, #tpu.memory_space<vmem>>, %arg3: memref<1x128xf32, #tpu.memory_space<vmem>>, %arg4: memref<128x128xbf16, #tpu.memory_space<vmem>>, %arg5: memref<1x128xf32, #tpu.memory_space<vmem>>, %arg6: memref<128x128xbf16, #tpu.memory_space<vmem>>, %arg7: memref<1x128xf32, #tpu.memory_space<vmem>>, %arg8: memref<8x128xbf16, #tpu.memory_space<vmem>>) attributes {dimension_semantics = [#tpu.dimension_semantics<parallel>], iteration_bounds = array<i64: 1>, scalar_prefetch = 0 : i64, scratch_operands = 0 : i64, tpu.core_type = #tpu.core_type<tc>, window_params = [{transform_indices = @transform_0, window_bounds = array<i64: 8, 784>}, {pipeline_mode = #tpu.pipeline_mode<synchronous>, transform_indices = @transform_1, window_bounds = array<i64: 784, 128>}, {pipeline_mode = #tpu.pipeline_mode<synchronous>, transform_indices = @transform_2, window_bounds = array<i64: 1, 128>}, {pipeline_mode = #tpu.pipeline_mode<synchronous>, transform_indices = @transform_3, window_bounds = array<i64: 128, 128>}, {pipeline_mode = #tpu.pipeline_mode<synchronous>, transform_indices = @transform_4, window_bounds = array<i64: 1, 128>}, {pipeline_mode = #tpu.pipeline_mode<synchronous>, transform_indices = @transform_5, window_bounds = array<i64: 128, 128>}, {pipeline_mode = #tpu.pipeline_mode<synchronous>, transform_indices = @transform_6, window_bounds = array<i64: 1, 128>}, {transform_indices = @transform_7, window_bounds = array<i64: 8, 128>}]} {
    %c0 = arith.constant 0 : index
    %c0_0 = arith.constant 0 : index
    %0 = vector.load %arg1[%c0, %c0_0] : memref<8x784xf32, #tpu.memory_space<vmem>>, vector<8x784xf32>
    %1 = arith.truncf %0 : vector<8x784xf32> to vector<8x784xbf16>
    %c0_1 = arith.constant 0 : index
    %c0_2 = arith.constant 0 : index
    %2 = vector.load %arg2[%c0_1, %c0_2] : memref<784x128xbf16, #tpu.memory_space<vmem>>, vector<784x128xbf16>
    %cst = arith.constant dense<0.000000e+00> : vector<8x128xf32>
    %3 = tpu.matmul %1, %2, %cst {dimension_numbers = #tpu.dot_dimension_numbers<[1], [0], [0], [1], [0, 0, 1, 1], [], []>} : vector<8x784xbf16>, vector<784x128xbf16>, vector<8x128xf32> -> vector<8x128xf32>
    %c0_3 = arith.constant 0 : index
    %c0_4 = arith.constant 0 : index
    %4 = vector.load %arg3[%c0_3, %c0_4] : memref<1x128xf32, #tpu.memory_space<vmem>>, vector<1x128xf32>
    %5 = vector.broadcast %4 : vector<1x128xf32> to vector<8x128xf32>
    %6 = arith.addf %3, %5 : vector<8x128xf32>
    %cst_5 = arith.constant 0.000000e+00 : f32
    %7 = vector.broadcast %cst_5 : f32 to vector<8x128xf32>
    %8 = arith.maximumf %6, %7 : vector<8x128xf32>
    %9 = arith.truncf %8 : vector<8x128xf32> to vector<8x128xbf16>
    %c0_6 = arith.constant 0 : index
    %c0_7 = arith.constant 0 : index
    %10 = vector.load %arg4[%c0_6, %c0_7] : memref<128x128xbf16, #tpu.memory_space<vmem>>, vector<128x128xbf16>
    %cst_8 = arith.constant dense<0.000000e+00> : vector<8x128xf32>
    %11 = tpu.matmul %9, %10, %cst_8 {dimension_numbers = #tpu.dot_dimension_numbers<[1], [0], [0], [1], [0, 0, 1, 1], [], []>} : vector<8x128xbf16>, vector<128x128xbf16>, vector<8x128xf32> -> vector<8x128xf32>
    %c0_9 = arith.constant 0 : index
    %c0_10 = arith.constant 0 : index
    %12 = vector.load %arg5[%c0_9, %c0_10] : memref<1x128xf32, #tpu.memory_space<vmem>>, vector<1x128xf32>
    %13 = vector.broadcast %12 : vector<1x128xf32> to vector<8x128xf32>
    %14 = arith.addf %11, %13 : vector<8x128xf32>
    %cst_11 = arith.constant 0.000000e+00 : f32
    %15 = vector.broadcast %cst_11 : f32 to vector<8x128xf32>
    %16 = arith.maximumf %14, %15 : vector<8x128xf32>
    %17 = arith.truncf %16 : vector<8x128xf32> to vector<8x128xbf16>
    %c0_12 = arith.constant 0 : index
    %c0_13 = arith.constant 0 : index
    %18 = vector.load %arg6[%c0_12, %c0_13] : memref<128x128xbf16, #tpu.memory_space<vmem>>, vector<128x128xbf16>
    %cst_14 = arith.constant dense<0.000000e+00> : vector<8x128xf32>
    %19 = tpu.matmul %17, %18, %cst_14 {dimension_numbers = #tpu.dot_dimension_numbers<[1], [0], [0], [1], [0, 0, 1, 1], [], []>} : vector<8x128xbf16>, vector<128x128xbf16>, vector<8x128xf32> -> vector<8x128xf32>
    %c0_15 = arith.constant 0 : index
    %c0_16 = arith.constant 0 : index
    %20 = vector.load %arg7[%c0_15, %c0_16] : memref<1x128xf32, #tpu.memory_space<vmem>>, vector<1x128xf32>
    %21 = vector.broadcast %20 : vector<1x128xf32> to vector<8x128xf32>
    %22 = arith.addf %19, %21 : vector<8x128xf32>
    %23 = arith.truncf %22 : vector<8x128xf32> to vector<8x128xbf16>
    %c0_17 = arith.constant 0 : index
    %c0_18 = arith.constant 0 : index
    %24 = vector.load %arg8[%c0_17, %c0_18] : memref<8x128xbf16, #tpu.memory_space<vmem>>, vector<8x128xbf16>
    tpu.vector_store %arg8[%c0_17, %c0_18], %23 {strides = array<i32>} : memref<8x128xbf16, #tpu.memory_space<vmem>>, vector<8x128xbf16>,
    return
  }
  func.func @transform_0(%arg0: i32) -> (i32, i32) {
    %c0_i32 = arith.constant 0 : i32
    %c0_i32_0 = arith.constant 0 : i32
    return %arg0, %c0_i32 : i32, i32
  }
  func.func @transform_1(%arg0: i32) -> (i32, i32) {
    %c0_i32 = arith.constant 0 : i32
    %c0_i32_0 = arith.constant 0 : i32
    %c0_i32_1 = arith.constant 0 : i32
    return %c0_i32, %c0_i32_0 : i32, i32
  }
  func.func @transform_2(%arg0: i32) -> (i32, i32) {
    %c0_i32 = arith.constant 0 : i32
    %c0_i32_0 = arith.constant 0 : i32
    %c0_i32_1 = arith.constant 0 : i32
    return %c0_i32, %c0_i32_0 : i32, i32
  }
  func.func @transform_3(%arg0: i32) -> (i32, i32) {
    %c0_i32 = arith.constant 0 : i32
    %c0_i32_0 = arith.constant 0 : i32
    %c0_i32_1 = arith.constant 0 : i32
    return %c0_i32, %c0_i32_0 : i32, i32
  }
  func.func @transform_4(%arg0: i32) -> (i32, i32) {
    %c0_i32 = arith.constant 0 : i32
    %c0_i32_0 = arith.constant 0 : i32
    %c0_i32_1 = arith.constant 0 : i32
    return %c0_i32, %c0_i32_0 : i32, i32
  }
  func.func @transform_5(%arg0: i32) -> (i32, i32) {
    %c0_i32 = arith.constant 0 : i32
    %c0_i32_0 = arith.constant 0 : i32
    %c0_i32_1 = arith.constant 0 : i32
    return %c0_i32, %c0_i32_0 : i32, i32
  }
  func.func @transform_6(%arg0: i32) -> (i32, i32) {
    %c0_i32 = arith.constant 0 : i32
    %c0_i32_0 = arith.constant 0 : i32
    %c0_i32_1 = arith.constant 0 : i32
    return %c0_i32, %c0_i32_0 : i32, i32
  }
  func.func @transform_7(%arg0: i32) -> (i32, i32) {
    %c0_i32 = arith.constant 0 : i32
    %c0_i32_0 = arith.constant 0 : i32
    return %arg0, %c0_i32 : i32, i32
  }
}

</mosaic_0001>

<bundles_post_ra>
// kernel: simple_nn_forward.1
= control target key start
LH: loop header
LB: loop body
LE: loop exit
PB: predicated region body
PF: predicated region fallthrough
CT: control target
= control target key end

     0   :  { %12 = vsyncpa [#allocation3], 0  ;;  %s1146_s24 = smov [#allocation2]   ;;  %s1307_s0 = inlined_call_operand.vmem [shape: f32[8,784], index: 0, kind: input, shape index: {}]   ;;  %s1308_s1 = inlined_call_operand.hbm [shape: bf16[784,128], index: 1, kind: input, shape index: {}]   ;;  %s1309_s2 = inlined_call_operand.vmem [shape: f32[1,128], index: 2, kind: input, shape index: {}]   ;;  %s1310_s3 = inlined_call_operand.vmem [shape: bf16[128,128], index: 3, kind: input, shape index: {}]   ;;  %s1311_s4 = inlined_call_operand.vmem [shape: f32[1,128], index: 4, kind: input, shape index: {}]   ;;  %s1312_s5 = inlined_call_operand.vmem [shape: bf16[128,128], index: 5, kind: input, shape index: {}]   ;;  %s1313_s6 = inlined_call_operand.vmem [shape: f32[1,128], index: 6, kind: input, shape index: {}]   ;;  %s1314_s7 = inlined_call_operand.vmem [shape: bf16[8,128], index: 7, kind: output, shape index: {}]  }
   0x1   :  { %s20_s25 = sshll.u32 %s1146_s24, 4  ;;  %s1122_s28 = scalar_lea.hbm %s1308_s1, 6272  ;;  %s21_s25 = int_to_ptr.vmem [resolvable:$true] %s20_s25 }
   0x2   :  { %p1123_p0 = scmp.ne.s32.totalorder %s1308_s1, %s1122_s28  ;;  %p1126_p1 = scmp.lt.u32.totalorder %s1122_s28, %s1308_s1 }
   0x4   :  { %p1128_p2 = pnand %p1126_p1, %p1123_p0 }
   0x6   :  { %1131 = shalt.err (!%p1128_p2)
}
   0x7   :  { %s1132_s10 = scalar_lea.vmem %s21_s25, 6272  ;;  %p1137_p4 = scmp.lt.s32.totalorder %s21_s25, %s21_s25 }
   0x8   :  { %p1133_p3 = scmp.ne.s32.totalorder %s21_s25, %s1132_s10  ;;  %p1138_p5 = scmp.lt.s32.totalorder %s1132_s10, %s1132_s10 }
   0xa   :  { %p1139_p6 = por %p1138_p5, %p1137_p4 }
   0xc   :  { %p1140_p7 = pnand %p1139_p6, %p1133_p3 }
   0xe   :  { %1143 = shalt.err (!%p1140_p7)
}
   0xf   :  { %s1147_s11 = smov 64   ;;  %s1148_s12 = smov 4  }
  0x10   :  { %26 = dma.hbm_to_vmem [thread:$0]  %s1308_s1, 6272, %s21_s25, [#allocation3], %s1147_s11, %s1147_s11, %s1148_s12  }
  0x11   :  { %1144 = dma.done.wait [#allocation3], 6272  }
  0x12   :  { %1145 = vsyncadd [#allocation3], 4294961024  ;;  %v1057_v0 = vld [vmem:[#allocation2 + $0x40] sm:$0xff]   ;;  %v1061_v4 = vld [vmem:[#allocation2 + $0x48] sm:$0xff]   ;;  %v1149_v44 = vmov 0.0   ;;  %vm1150_vm0 = vmmov 0  }
  0x13   :  { %v1058_v1 = vld [vmem:[#allocation2] sm:$0xff]   ;;  %920 = vmatprep.subr.bf16.mxu0 %v1057_v0  ;;  %v1062_v5 = vld [vmem:[#allocation2 + $0x8] sm:$0xff]   ;;  %v1065_v8 = vld [vmem:[#allocation2 + $0x50] sm:$0xff]   ;;  %vm454_vm1 = vcmask 130048  }
  0x14   :  { %v1059_v2 = vld [vmem:[#allocation2 + $0xc0] sm:$0xff]   ;;  %921 = vmatpush3.bf16.msra.mxu0 %v1058_v1  ;;  %v1063_v6 = vld [vmem:[#allocation2 + $0xc8] sm:$0xff]   ;;  %v1066_v9 = vld [vmem:[#allocation2 + $0x10] sm:$0xff]  }
  0x15   :  { %v1060_v3 = vld [vmem:[#allocation2 + $0x80] sm:$0xff]   ;;  %942 = vmatprep.subr.bf16.mxu1 %v1059_v2  ;;  %922 = vmatprep.subr.bf16.mxu0 %v1061_v4  ;;  %v1064_v7 = vld [vmem:[#allocation2 + $0x88] sm:$0xff]   ;;  %v1067_v10 = vld [vmem:[#allocation2 + $0xd0] sm:$0xff]  }
  0x16   :  { %943 = vmatpush3.bf16.msra.mxu1 %v1060_v3  ;;  %v1068_v11 = vld [vmem:[#allocation2 + $0x90] sm:$0xff]   ;;  %v1069_v12 = vld [vmem:[#allocation2 + $0x58] sm:$0xff]   ;;  %v1073_v16 = vld [vmem:[#allocation2 + $0x60] sm:$0xff]  }
  0x17   :  { %944 = vmatprep.subr.bf16.mxu1 %v1063_v6  ;;  %v1070_v13 = vld [vmem:[#allocation2 + $0x18] sm:$0xff]   ;;  %v1074_v17 = vld [vmem:[#allocation2 + $0x20] sm:$0xff]   ;;  %v1077_v20 = vld [vmem:[#allocation2 + $0x68] sm:$0xff]  }
  0x18   :  { %923 = vmatpush3.bf16.msra.mxu0 %v1062_v5  ;;  %v1071_v14 = vld [vmem:[#allocation2 + $0xd8] sm:$0xff]   ;;  %v1075_v18 = vld [vmem:[#allocation2 + $0xe0] sm:$0xff]   ;;  %v1078_v21 = vld [vmem:[#allocation2 + $0x28] sm:$0xff]  }
  0x19   :  { %924 = vmatprep.subr.bf16.mxu0 %v1065_v8  ;;  %v1072_v15 = vld [vmem:[#allocation2 + $0x98] sm:$0xff]   ;;  %v1076_v19 = vld [vmem:[#allocation2 + $0xa0] sm:$0xff]   ;;  %v1079_v22 = vld [vmem:[#allocation2 + $0xe8] sm:$0xff]  }
  0x1a   :  { %945 = vmatpush3.bf16.msra.mxu1 %v1064_v7  ;;  %v1080_v23 = vld [vmem:[#allocation2 + $0xa8] sm:$0xff]   ;;  %v1081_v24 = vld [vmem:[#allocation2 + $0x70] sm:$0xff]   ;;  %v1085_v28 = vld [vmem:[#allocation2 + $0x78] sm:$0xff]  }
  0x1b   :  { %946 = vmatprep.subr.bf16.mxu1 %v1067_v10  ;;  %v1082_v25 = vld [vmem:[#allocation2 + $0x30] sm:$0xff]   ;;  %v1086_v29 = vld [vmem:[#allocation2 + $0x38] sm:$0xff]   ;;  %v42_v31 = vld [vmem:[%s1307_s0 + $0x8] sm:$0xff] }
  0x1c   :  { %925 = vmatpush3.bf16.msra.mxu0 %v1066_v9  ;;  %v1083_v26 = vld [vmem:[#allocation2 + $0xf0] sm:$0xff]   ;;  %v1087_v30 = vld [vmem:[#allocation2 + $0xf8] sm:$0xff]   ;;  %v49_v32 = vpack.c.bf16 %v42_v31, %v42_v31  ;;  %v41_v34 = vld [vmem:[%s1307_s0] sm:$0xff] }
  0x1d   :  { %926 = vmatprep.subr.bf16.mxu0 %v1069_v12  ;;  %v1084_v27 = vld [vmem:[#allocation2 + $0xb0] sm:$0xff]   ;;  %v1088_v33 = vld [vmem:[#allocation2 + $0xb8] sm:$0xff]   ;;  %v48_v35 = vpack.c.bf16 %v41_v34, %v41_v34  ;;  %v1089_v36 = vld [vmem:[#allocation2 + $0x140] sm:$0xff]  }
  0x1e   :  { %947 = vmatpush3.bf16.msra.mxu1 %v1068_v11  ;;  %v44_v37 = vld [vmem:[%s1307_s0 + $0x18] sm:$0xff]  ;;  %490 = vmatprep.mubr.bf16.mxu0 %v49_v32  ;;  %v1090_v39 = vld [vmem:[#allocation2 + $0x100] sm:$0xff]   ;;  %v43_v40 = vld [vmem:[%s1307_s0 + $0x10] sm:$0xff] }
  0x1f   :  { %948 = vmatprep.subr.bf16.mxu1 %v1071_v14  ;;  %v51_v38 = vpack.c.bf16 %v44_v37, %v44_v37  ;;  %v50_v41 = vpack.c.bf16 %v43_v40, %v43_v40  ;;  %v1091_v42 = vld [vmem:[#allocation2 + $0x148] sm:$0xff]   ;;  %v1093_v45 = vld [vmem:[#allocation2 + $0x150] sm:$0xff]   ;;  %v1095_v47 = vld [vmem:[#allocation2 + $0x158] sm:$0xff]  }
  0x20   :  { %927 = vmatpush3.bf16.msra.mxu0 %v1070_v13  ;;  %v1092_v43 = vld [vmem:[#allocation2 + $0x108] sm:$0xff]   ;;  %v1094_v46 = vld [vmem:[#allocation2 + $0x110] sm:$0xff]   ;;  %v1096_v48 = vld [vmem:[#allocation2 + $0x118] sm:$0xff]  }
  0x21   :  { %928 = vmatprep.subr.bf16.mxu0 %v1073_v16  ;;  %530 = vmatprep.mubr.bf16.mxu1 %v51_v38  ;;  %v1097_v49 = vld [vmem:[#allocation2 + $0x160] sm:$0xff]   ;;  %v1099_v51 = vld [vmem:[#allocation2 + $0x168] sm:$0xff]   ;;  %v1101_v55 = vld [vmem:[#allocation2 + $0x170] sm:$0xff]  }
  0x22   :  { %949 = vmatpush3.bf16.msra.mxu1 %v1072_v15  ;;  %v1098_v50 = vld [vmem:[#allocation2 + $0x120] sm:$0xff]   ;;  %v1100_v52 = vld [vmem:[#allocation2 + $0x128] sm:$0xff]   ;;  %v47_v57 = vld [vmem:[%s1307_s0 + $0x30] sm:$0xff] }
  0x23   :  { %950 = vmatprep.subr.bf16.mxu1 %v1075_v18  ;;  %v1105_v53 = vld [vmem:[#allocation2 + $0x180] sm:$0xff]   ;;  %v46_v54 = vld [vmem:[%s1307_s0 + $0x28] sm:$0xff]  ;;  %v54_v58 = vpack.c.bf16 %v47_v57, %v47_v57  ;;  %v1102_v59 = vld [vmem:[#allocation2 + $0x130] sm:$0xff]  }
  0x24   :  { %929 = vmatpush3.bf16.msra.mxu0 %v1074_v17  ;;  %v53_v56 = vpack.c.bf16 %v46_v54, %v46_v54  ;;  %v1103_v60 = vld [vmem:[#allocation2 + $0x178] sm:$0xff]   ;;  %v45_v62 = vld [vmem:[%s1307_s0 + $0x20] sm:$0xff]  ;;  %v1107_v1 = vld [vmem:[%s1310_s3 + $0x8] sm:$0xff]  }
  0x25   :  { %930 = vmatprep.subr.bf16.mxu0 %v1077_v20  ;;  %v1104_v61 = vld [vmem:[#allocation2 + $0x138] sm:$0xff]   ;;  %v52_v63 = vpack.c.bf16 %v45_v62, %v45_v62  ;;  %v1106_v0 = vld [vmem:[%s1310_s3] sm:$0xff]   ;;  %v1108_v2 = vld [vmem:[%s1310_s3 + $0x10] sm:$0xff]  }
  0x26   :  { %951 = vmatpush3.bf16.msra.mxu1 %v1076_v19  ;;  %v1109_v3 = vld [vmem:[%s1310_s3 + $0x18] sm:$0xff]   ;;  %v1110_v4 = vld [vmem:[%s1310_s3 + $0x20] sm:$0xff]   ;;  %v1111_v5 = vld [vmem:[%s1310_s3 + $0x28] sm:$0xff]  }
  0x27   :  { %952 = vmatprep.subr.bf16.mxu1 %v1079_v22  ;;  %v1112_v6 = vld [vmem:[%s1310_s3 + $0x30] sm:$0xff]   ;;  %v1113_v7 = vld [vmem:[%s1310_s3 + $0x38] sm:$0xff]   ;;  %v1114_v8 = vld [vmem:[%s1312_s5] sm:$0xff]  }
  0x28   :  { %931 = vmatpush3.bf16.msra.mxu0 %v1078_v21  ;;  %v1115_v9 = vld [vmem:[%s1312_s5 + $0x8] sm:$0xff]   ;;  %v1116_v10 = vld [vmem:[%s1312_s5 + $0x10] sm:$0xff]   ;;  %v1117_v11 = vld [vmem:[%s1312_s5 + $0x18] sm:$0xff]  }
  0x29   :  { %932 = vmatprep.subr.bf16.mxu0 %v1081_v24  ;;  %v1118_v12 = vld [vmem:[%s1312_s5 + $0x20] sm:$0xff]   ;;  %v1119_v13 = vld [vmem:[%s1312_s5 + $0x28] sm:$0xff]   ;;  %v1120_v40 = vld [vmem:[%s1312_s5 + $0x30] sm:$0xff]  }
  0x2a   :  { %953 = vmatpush3.bf16.msra.mxu1 %v1080_v23  ;;  %v851_v15 = vld [vmem:[%s1309_s2] ss:$0 sm:$0xff] }
  0x2b   :  { %954 = vmatprep.subr.bf16.mxu1 %v1083_v26 }
  0x2c   :  { %933 = vmatpush3.bf16.msra.mxu0 %v1082_v25 }
  0x2d   :  { %934 = vmatprep.subr.bf16.mxu0 %v1085_v28 }
  0x2e   :  { %955 = vmatpush3.bf16.msra.mxu1 %v1084_v27 }
  0x2f   :  { %956 = vmatprep.subr.bf16.mxu1 %v1087_v30 }
  0x30   :  { %935 = vmatpush3.bf16.msra.mxu0 %v1086_v29 }
  0x31   :  { %964 = vmatprep.subr.bf16.mxu0 %v1089_v36 }
  0x32   :  { %957 = vmatpush3.bf16.msra.mxu1 %v1088_v33 }
  0x33   :  { %491 = vmatmul.mubr.bf16.vlgmr.msra.gmra.mrb[0].mxu0 %v48_v35  ;;  %1006 = vmatprep.subr.bf16.mxu1 %v1149_v44 }
  0x34   :  { %965 = vmatpush3.bf16.msra.mxu0 %v1090_v39  ;;  %570 = vmatprep.mubr.bf16.mxu0 %v53_v56 }
  0x35   :  { %531 = vmatmul.mubr.bf16.vlgmr.msra.gmra.mrb[0].mxu1 %v50_v41  ;;  %966 = vmatprep.subr.bf16.mxu0 %v1091_v42  ;;  %v1121_v41 = vld [vmem:[%s1312_s5 + $0x38] sm:$0xff]   ;;  %v902_v42 = vld [vmem:[%s1311_s4] ss:$0 sm:$0xff] }
  0x36   :  { %1008 = vmatprep.mubr.msk.bf16.mxu1 %vm1150_vm0, %v1149_v44  ;;  %1007 = vmatpush3.bf16.msra.mxu1 %v1105_v53 }
  0x37   :  { %1012 = vmatprep.subr.bf16.mxu1 %v1149_v44 }
  0x38   :  { %967 = vmatpush3.bf16.msra.mxu0 %v1092_v43 }
  0x39   :  { %968 = vmatprep.subr.bf16.mxu0 %v1093_v45 }
  0x3c   :  { %969 = vmatpush3.bf16.msra.mxu0 %v1094_v46 }
  0x3d   :  { %970 = vmatprep.subr.bf16.mxu0 %v1095_v47  ;;  %1009 = vmatmul.mubr.msk.bf16.vlgmr.msra.gmra.mrb[4].mxu1 %vm454_vm1, %v54_v58 }
  0x3e   :  { %1028 = vmatprep.mubr.msk.bf16.mxu1 %vm1150_vm0, %v1149_v44  ;;  %1013 = vmatpush3.bf16.msra.mxu1 %v1106_v0 }
  0x3f   :  { %1014 = vmatprep.subr.bf16.mxu1 %v1149_v44 }
  0x40   :  { %971 = vmatpush3.bf16.msra.mxu0 %v1096_v48 }
  0x41   :  { %972 = vmatprep.subr.bf16.mxu0 %v1097_v49 }
  0x42   :  { %1015 = vmatpush3.bf16.msra.mxu1 %v1107_v1 }
  0x43   :  { %1016 = vmatprep.subr.bf16.mxu1 %v1149_v44 }
  0x44   :  { %973 = vmatpush3.bf16.msra.mxu0 %v1098_v50 }
  0x45   :  { %974 = vmatprep.subr.bf16.mxu0 %v1099_v51 }
  0x46   :  { %1017 = vmatpush3.bf16.msra.mxu1 %v1108_v2 }
  0x47   :  { %1018 = vmatprep.subr.bf16.mxu1 %v1149_v44 }
  0x48   :  { %975 = vmatpush3.bf16.msra.mxu0 %v1100_v52 }
  0x49   :  { %976 = vmatprep.subr.bf16.mxu0 %v1101_v55 }
  0x4a   :  { %1019 = vmatpush3.bf16.msra.mxu1 %v1109_v3 }
  0x4b   :  { %1020 = vmatprep.subr.bf16.mxu1 %v1149_v44 }
  0x4c   :  { %977 = vmatpush3.bf16.msra.mxu0 %v1102_v59 }
  0x4d   :  { %978 = vmatprep.subr.bf16.mxu0 %v1103_v60 }
  0x4e   :  { %1021 = vmatpush3.bf16.msra.mxu1 %v1110_v4 }
  0x4f   :  { %1022 = vmatprep.subr.bf16.mxu1 %v1149_v44 }
  0x50   :  { %979 = vmatpush3.bf16.msra.mxu0 %v1104_v61 }
  0x51   :  { %1032 = vmatprep.subr.bf16.mxu0 %v1149_v44 }
  0x52   :  { %1023 = vmatpush3.bf16.msra.mxu1 %v1111_v5 }
  0x53   :  { %571 = vmatmul.mubr.bf16.vlgmr.msra.gmra.mrb[4].mxu0 %v52_v63  ;;  %1024 = vmatprep.subr.bf16.mxu1 %v1149_v44 }
  0x54   :  { %1048 = vmatprep.mubr.msk.bf16.mxu0 %vm1150_vm0, %v1149_v44  ;;  %1033 = vmatpush3.bf16.msra.mxu0 %v1114_v8 }
  0x55   :  { %1034 = vmatprep.subr.bf16.mxu0 %v1149_v44 }
  0x56   :  { %1025 = vmatpush3.bf16.msra.mxu1 %v1112_v6 }
  0x57   :  { %1026 = vmatprep.subr.bf16.mxu1 %v1149_v44 }
  0x58   :  { %1035 = vmatpush3.bf16.msra.mxu0 %v1115_v9 }
  0x59   :  { %1036 = vmatprep.subr.bf16.mxu0 %v1149_v44 }
  0x5a   :  { %1027 = vmatpush3.bf16.msra.mxu1 %v1113_v7 }
  0x5c   :  { %1037 = vmatpush3.bf16.msra.mxu0 %v1116_v10 }
  0x5d   :  { %1038 = vmatprep.subr.bf16.mxu0 %v1149_v44 }
  0x60   :  { %1039 = vmatpush3.bf16.msra.mxu0 %v1117_v11 }
  0x61   :  { %1040 = vmatprep.subr.bf16.mxu0 %v1149_v44 }
  0x64   :  { %1041 = vmatpush3.bf16.msra.mxu0 %v1118_v12 }
  0x65   :  { %1042 = vmatprep.subr.bf16.mxu0 %v1149_v44 }
  0x68   :  { %1043 = vmatpush3.bf16.msra.mxu0 %v1119_v13 }
  0x69   :  { %1044 = vmatprep.subr.bf16.mxu0 %v1149_v44 }
  0x6c   :  { %1045 = vmatpush3.bf16.msra.mxu0 %v1120_v40 }
  0x6d   :  { %1046 = vmatprep.subr.bf16.mxu0 %v1149_v44  ;;  %v911_v44 = vld [vmem:[%s1313_s6] ss:$0 sm:$0xff] }
  0x70   :  { %1047 = vmatpush3.bf16.msra.mxu0 %v1121_v41 }
 0x106   :  { %v936_v14 = vpop.f32.mrb[0].mxu0 }
 0x107   :  { %v937_v16 = vpop.f32.mrb[1].mxu0 }
 0x108   :  { %v938_v17 = vadd.f32 %v937_v16, %v936_v14  ;;  %v939_v18 = vpop.f32.mrb[2].mxu0  ;;  %v958_v19 = vpop.f32.mrb[0].mxu1 }
 0x109   :  { %v940_v20 = vpop.f32.mrb[3].mxu0  ;;  %v959_v22 = vpop.f32.mrb[1].mxu1 }
 0x10a   :  { %v493_v21 = vadd.f32 %v938_v17, %v851_v15  ;;  %v960_v23 = vadd.f32 %v959_v22, %v958_v19  ;;  %v961_v24 = vpop.f32.mrb[2].mxu1 }
 0x10b   :  { %v962_v25 = vpop.f32.mrb[3].mxu1 }
 0x10c   :  { %v533_v26 = vadd.f32 %v960_v23, %v493_v21 }
 0x110   :  { %v612_v27 = vpop.f32.mrb[4].mxu1 }
 0x111   :  { %v1010_v28 = vpop.f32.mrb[5].mxu1 }
 0x112   :  { %v615_v29 = vpop.f32.mrb[6].mxu1 }
 0x113   :  { %v1011_v30 = vpop.f32.mrb[7].mxu1 }
 0x126   :  { %v980_v31 = vpop.f32.mrb[4].mxu0 }
 0x127   :  { %v981_v32 = vpop.f32.mrb[5].mxu0 }
 0x128   :  { %v982_v33 = vadd.f32 %v981_v32, %v980_v31  ;;  %v983_v34 = vpop.f32.mrb[6].mxu0 }
 0x129   :  { %v984_v35 = vpop.f32.mrb[7].mxu0 }
 0x12a   :  { %v573_v36 = vadd.f32 %v982_v33, %v533_v26 }
 0x12c   :  { %v613_v37 = vadd.f32 %v612_v27, %v573_v36 }
 0x12e   :  { %v618_v38 = vmax.f32 %v613_v37, 0.0 }
 0x130   :  { %v619_v39 = vpack.c.bf16 %v618_v38, %v618_v38 }
 0x132   :  { %1029 = vmatmul.mubr.bf16.vlgmr.msra.gmra.mrb[8].mxu1 %v619_v39 }
 0x205   :  { %v725_v43 = vpop.f32.mrb[8].mxu1 }
 0x206   :  { %v726_v45 = vadd.f32 %v902_v42, %v725_v43  ;;  %v1030_v46 = vpop.f32.mrb[9].mxu1 }
 0x207   :  { %v728_v47 = vpop.f32.mrb[10].mxu1 }
 0x208   :  { %v731_v48 = vmax.f32 %v726_v45, 0.0  ;;  %v1031_v49 = vpop.f32.mrb[11].mxu1 }
 0x20a   :  { %v732_v50 = vpack.c.bf16 %v731_v48, %v731_v48 }
 0x20c   :  { %1049 = vmatmul.mubr.bf16.vlgmr.msra.gmra.mrb[8].mxu0 %v732_v50 }
 0x2df   :  { %v838_v51 = vpop.f32.mrb[8].mxu0 }
 0x2e0   :  { %v839_v52 = vadd.f32 %v911_v44, %v838_v51  ;;  %v1050_v53 = vpop.f32.mrb[9].mxu0 }
 0x2e1   :  { %v841_v54 = vpop.f32.mrb[10].mxu0 }
 0x2e2   :  { %v844_v55 = vpack.c.bf16 %v839_v52, %v839_v52  ;;  %v1051_v56 = vpop.f32.mrb[11].mxu0 }
 0x2e4   :  { %845 = vst [vmem:[%s1314_s7] sm:$0xf] %v844_v55 }
 0x2e5   :  { %850 = vsyncpa [#allocation3], 1 }

</bundles_post_ra>
